<compile_context>
chip_gen: v6e
topology: v6e:2x2x1
jax: 0.10.0
libtpu: 0.0.40
codegen_flags: <defaults>
</compile_context>

<pallas_src>
import functools

import jax
import jax.numpy as jnp
from jax import lax
from jax.experimental import pallas as pl
from jax.experimental.pallas import tpu as pltpu


def _make_denseblock_kernel(n_layers, c0, k, h, w):
    """Build the fused kernel for one batch element.

    Slab layout (== out_ref block, shape (C_total, S) f32):
      * channels (sublane axis) ordered [f_{L-1}, ..., f_1, f_0, x_input],
        i.e. exactly the PyTorch output channel order.
      * spatial (lane axis) = flattened zero-padded image of shape
        (H+2, W+2) with one extra zero guard element at each end, so every
        3x3 tap is a contiguous lane-slice of length H*(W+2).
    """
    hp, wp = h + 2, w + 2
    hwp = h * wp                 # one full padded row per output row
    s = hp * wp + 2              # +2 guard elements (one each end)
    c_total = c0 + n_layers * k
    base = 1 + wp                # slab index of output position (row 1, col 0)

    def kernel(*refs):
        x_ref = refs[0]                          # (c0, s)      f32, pre-padded input
        mask_ref = refs[1]                       # (1, hwp)     f32, zeros at pad cols
        w_refs = refs[2:2 + n_layers]            # (k, 9*cin_i) bf16
        scale_ref = refs[2 + n_layers]           # (L, k, 1)    f32 folded BN scale
        bias_ref = refs[3 + n_layers]            # (L, k, 1)    f32 folded BN bias
        out_ref = refs[4 + n_layers]             # (c_total, s) f32 resident slab

        # Zero the slab (pad ring + guards must be 0), then drop the input in.
        out_ref[...] = jnp.zeros_like(out_ref)
        out_ref[n_layers * k:c_total, :] = x_ref[...].astype(out_ref.dtype)

        mask = mask_ref[...]                     # (1, hwp)

        for i in range(n_layers):
            cs = (n_layers - i) * k              # first input-channel row this layer
            cin = c_total - cs

            # Build the 9-tap patch matrix: 9 contiguous lane-shifted slices of
            # the slab, stacked along channels -> one big MXU contraction.
            taps = []
            for dy in range(3):
                for dx in range(3):
                    off = (dy - 1) * wp + (dx - 1)
                    s0 = base + off
                    taps.append(out_ref[cs:c_total, s0:s0 + hwp])
            patches = jnp.concatenate(taps, axis=0).astype(jnp.bfloat16)  # (9*cin, hwp)

            wmat = w_refs[i][...]                                         # (k, 9*cin) bf16
            acc = jnp.dot(wmat, patches,
                          preferred_element_type=jnp.float32)             # (k, hwp) f32

            # Folded BN affine + ReLU in f32; mask zeroes the garbage values
            # computed at the pad columns so the slab's zero padding survives.
            feat = jnp.maximum(acc * scale_ref[i] + bias_ref[i], 0.0) * mask
            out_ref[cs - k:cs, base:base + hwp] = feat.astype(out_ref.dtype)

    return kernel


def denseblock_fused(x_pre, colmask, w_list, scales, biases, *, n_layers, c0, k, h, w):
    """x_pre: (N, c0, S) f32 pre-padded input; returns (N, C_total, S) f32 slab."""
    n = x_pre.shape[0]
    hp, wp = h + 2, w + 2
    hwp = h * wp
    s = hp * wp + 2
    c_total = c0 + n_layers * k

    kernel = _make_denseblock_kernel(n_layers, c0, k, h, w)

    in_specs = [
        pl.BlockSpec((None, c0, s), lambda b: (b, 0, 0)),     # input (leading dim squeezed)
        pl.BlockSpec((1, hwp), lambda b: (0, 0)),             # pad-column mask
    ]
    in_specs += [pl.BlockSpec(wm.shape, lambda b: (0, 0)) for wm in w_list]
    in_specs += [
        pl.BlockSpec((n_layers, k, 1), lambda b: (0, 0, 0)),  # folded BN scales
        pl.BlockSpec((n_layers, k, 1), lambda b: (0, 0, 0)),  # folded BN biases
    ]

    return pl.pallas_call(
        kernel,
        out_shape=jax.ShapeDtypeStruct((n, c_total, s), jnp.float32),
        grid=(n,),
        in_specs=in_specs,
        out_specs=pl.BlockSpec((None, c_total, s), lambda b: (b, 0, 0)),
        compiler_params=pltpu.CompilerParams(
            dimension_semantics=("parallel",),          # megacore over batch
            vmem_limit_bytes=32 * 1024 * 1024),         # explicit scoped-VMEM limit
    )(x_pre, colmask, *w_list, scales, biases)


def init_denseblock_params(key, n_layers, input_channel, k, eps=1e-5):
    """Deterministic parameters.

    Conv weights stored kernel-ready as (K, 9*Cin): column index = tap*Cin + c
    with tap = dy*3 + dx.  BatchNorm (inference) folded to per-channel
    scale/bias (a conv bias would fold into `bias` the same way).
    """
    params = []
    for i in range(n_layers):
        cin = input_channel + k * i
        key, kw, kg, kb = jax.random.split(key, 4)
        fan_in = cin * 9
        bound = 1.0 / float(fan_in) ** 0.5
        w_hwio = jax.random.uniform(kw, (3, 3, cin, k), jnp.float32, -bound, bound)
        w2d = jnp.transpose(w_hwio.reshape(9, cin, k), (2, 0, 1)).reshape(k, 9 * cin)
        gamma = 1.0 + 0.1 * jax.random.normal(kg, (k,), jnp.float32)
        beta = 0.1 * jax.random.normal(kb, (k,), jnp.float32)
        running_mean = jnp.zeros((k,), jnp.float32)
        running_var = jnp.ones((k,), jnp.float32)
        scale = gamma / jnp.sqrt(running_var + eps)
        bias = beta - running_mean * scale
        params.append((w2d, scale, bias))
    return params


@functools.partial(jax.jit, static_argnames=("n_layers",))
def denseblock_forward_nchw(x_nchw, params, n_layers):
    """PyTorch-facing entry point: x is NCHW; returns NCHW."""
    n, c0, h, w = x_nchw.shape
    k = params[0][1].shape[0]
    hp, wp = h + 2, w + 2
    hwp = h * wp
    c_total = c0 + n_layers * k

    # One-time spatial zero-pad + flatten + 1-element guard at each end.
    xp = jnp.pad(x_nchw, ((0, 0), (0, 0), (1, 1), (1, 1)))
    x_pre = jnp.pad(xp.reshape(n, c0, hp * wp), ((0, 0), (0, 0), (1, 1)))

    # Mask that zeroes the pad columns of each output row in flattened coords.
    col = jnp.arange(hwp, dtype=jnp.int32) % wp
    colmask = jnp.where((col == 0) | (col == wp - 1), 0.0, 1.0)
    colmask = colmask.reshape(1, hwp).astype(jnp.float32)

    w_list = [p[0].astype(jnp.bfloat16) for p in params]       # bf16 MXU operands
    scales = jnp.stack([p[1] for p in params]).reshape(n_layers, k, 1)
    biases = jnp.stack([p[2] for p in params]).reshape(n_layers, k, 1)

    slab = denseblock_fused(x_pre, colmask, w_list, scales, biases,
                            n_layers=n_layers, c0=c0, k=k, h=h, w=w)

    # Strip guards + spatial padding; slab channel order is already the
    # PyTorch output order and the layout is already NCHW.
    y = slab[:, :, 1:1 + hp * wp].reshape(n, c_total, hp, wp)
    return y[:, :, 1:-1, 1:-1]


def _reference_forward_nchw(x_nchw, params, n_layers):
    """Plain-JAX reference (lax.conv, f32) for a correctness sanity check."""
    x = jnp.transpose(x_nchw, (0, 2, 3, 1))
    for i in range(n_layers):
        w2d, scale, bias = params[i]
        k = w2d.shape[0]
        cin = w2d.shape[1] // 9
        w_hwio = w2d.reshape(k, 3, 3, cin).transpose(1, 2, 3, 0)
        y = lax.conv_general_dilated(
            x, w_hwio, window_strides=(1, 1), padding="SAME",
            dimension_numbers=("NHWC", "HWIO", "NHWC"))
        y = jnp.maximum(y * scale + bias, 0.0)
        x = jnp.concatenate([y, x], axis=-1)
    return jnp.transpose(x, (0, 3, 1, 2))


if __name__ == "__main__":
    n_layers, input_channel, k = 3, 4, 4
    N, H, W = 2, 16, 16

    key = jax.random.PRNGKey(0)
    key, kx = jax.random.split(key)
    x = jax.random.normal(kx, (N, input_channel, H, W), jnp.float32)

    params = init_denseblock_params(key, n_layers, input_channel, k)
    params = tuple(tuple(p) for p in params)

    out = denseblock_forward_nchw(x, params, n_layers)
    out = jax.block_until_ready(out)

    expected_channels = input_channel + n_layers * k
    assert out.shape == (N, expected_channels, H, W), out.shape

    ref = _reference_forward_nchw(x, params, n_layers)
    max_err = float(jnp.max(jnp.abs(out - ref)))
    # bf16 matmul operands (f32 accumulation/epilogue) -> tolerance loosened
    # from 1e-3 to 2e-2 per the performance review; real layout/tap bugs would
    # produce O(0.5) errors and still be caught.
    assert jnp.allclose(out, ref, atol=2e-2, rtol=2e-2), max_err

    print("KERNEL_OK")
</pallas_src>

<mosaic_0001>
module attributes {stable_mosaic.version = 11 : i64} {
  func.func @kernel(%arg0: i32, %arg1: memref<1x4x326xf32, #tpu.memory_space<vmem>>, %arg2: memref<1x288xf32, #tpu.memory_space<vmem>>, %arg3: memref<4x36xbf16, #tpu.memory_space<vmem>>, %arg4: memref<4x72xbf16, #tpu.memory_space<vmem>>, %arg5: memref<4x108xbf16, #tpu.memory_space<vmem>>, %arg6: memref<3x4x1xf32, #tpu.memory_space<vmem>>, %arg7: memref<3x4x1xf32, #tpu.memory_space<vmem>>, %arg8: memref<1x16x326xf32, #tpu.memory_space<vmem>>) attributes {dimension_semantics = [#tpu.dimension_semantics<parallel>], iteration_bounds = array<i64: 2>, scalar_prefetch = 0 : i64, scratch_operands = 0 : i64, tpu.core_type = #tpu.core_type<tc>, window_params = [{transform_indices = @transform_0, window_bounds = array<i64: 1, 4, 326>}, {pipeline_mode = #tpu.pipeline_mode<synchronous>, transform_indices = @transform_1, window_bounds = array<i64: 1, 288>}, {pipeline_mode = #tpu.pipeline_mode<synchronous>, transform_indices = @transform_2, window_bounds = array<i64: 4, 36>}, {pipeline_mode = #tpu.pipeline_mode<synchronous>, transform_indices = @transform_3, window_bounds = array<i64: 4, 72>}, {pipeline_mode = #tpu.pipeline_mode<synchronous>, transform_indices = @transform_4, window_bounds = array<i64: 4, 108>}, {pipeline_mode = #tpu.pipeline_mode<synchronous>, transform_indices = @transform_5, window_bounds = array<i64: 3, 4, 1>}, {pipeline_mode = #tpu.pipeline_mode<synchronous>, transform_indices = @transform_6, window_bounds = array<i64: 3, 4, 1>}, {transform_indices = @transform_7, window_bounds = array<i64: 1, 16, 326>}]} {
    %cst = arith.constant 0.000000e+00 : f32
    %0 = vector.broadcast %cst : f32 to vector<16x326xf32>
    %c0 = arith.constant 0 : index
    %c0_0 = arith.constant 0 : index
    %c0_1 = arith.constant 0 : index
    %1 = vector.load %arg8[%c0, %c0_0, %c0_1] : memref<1x16x326xf32, #tpu.memory_space<vmem>>, vector<1x16x326xf32>
    %2 = vector.shape_cast %1 : vector<1x16x326xf32> to vector<16x326xf32>
    %3 = vector.shape_cast %0 : vector<16x326xf32> to vector<1x16x326xf32>
    tpu.vector_store %arg8[%c0, %c0_0, %c0_1], %3 {strides = array<i32>} : memref<1x16x326xf32, #tpu.memory_space<vmem>>, vector<1x16x326xf32>,
    %c0_2 = arith.constant 0 : index
    %c0_3 = arith.constant 0 : index
    %c0_4 = arith.constant 0 : index
    %4 = vector.load %arg1[%c0_2, %c0_3, %c0_4] : memref<1x4x326xf32, #tpu.memory_space<vmem>>, vector<1x4x326xf32>
    %5 = vector.shape_cast %4 : vector<1x4x326xf32> to vector<4x326xf32>
    %c0_5 = arith.constant 0 : index
    %c12 = arith.constant 12 : index
    %c0_6 = arith.constant 0 : index
    %6 = vector.load %arg8[%c0_5, %c12, %c0_6] : memref<1x16x326xf32, #tpu.memory_space<vmem>>, vector<1x4x326xf32>
    %7 = vector.shape_cast %6 : vector<1x4x326xf32> to vector<4x326xf32>
    %8 = vector.shape_cast %5 : vector<4x326xf32> to vector<1x4x326xf32>
    tpu.vector_store %arg8[%c0_5, %c12, %c0_6], %8 {strides = array<i32>} : memref<1x16x326xf32, #tpu.memory_space<vmem>>, vector<1x4x326xf32>,
    %c0_7 = arith.constant 0 : index
    %c0_8 = arith.constant 0 : index
    %9 = vector.load %arg2[%c0_7, %c0_8] : memref<1x288xf32, #tpu.memory_space<vmem>>, vector<1x288xf32>
    %c0_9 = arith.constant 0 : index
    %c12_10 = arith.constant 12 : index
    %c0_11 = arith.constant 0 : index
    %10 = vector.load %arg8[%c0_9, %c12_10, %c0_11] : memref<1x16x326xf32, #tpu.memory_space<vmem>>, vector<1x4x288xf32>
    %11 = vector.shape_cast %10 : vector<1x4x288xf32> to vector<4x288xf32>
    %c0_12 = arith.constant 0 : index
    %c12_13 = arith.constant 12 : index
    %c1 = arith.constant 1 : index
    %12 = vector.load %arg8[%c0_12, %c12_13, %c1] : memref<1x16x326xf32, #tpu.memory_space<vmem>>, vector<1x4x288xf32>
    %13 = vector.shape_cast %12 : vector<1x4x288xf32> to vector<4x288xf32>
    %c0_14 = arith.constant 0 : index
    %c12_15 = arith.constant 12 : index
    %c2 = arith.constant 2 : index
    %14 = vector.load %arg8[%c0_14, %c12_15, %c2] : memref<1x16x326xf32, #tpu.memory_space<vmem>>, vector<1x4x288xf32>
    %15 = vector.shape_cast %14 : vector<1x4x288xf32> to vector<4x288xf32>
    %c0_16 = arith.constant 0 : index
    %c12_17 = arith.constant 12 : index
    %c18 = arith.constant 18 : index
    %16 = vector.load %arg8[%c0_16, %c12_17, %c18] : memref<1x16x326xf32, #tpu.memory_space<vmem>>, vector<1x4x288xf32>
    %17 = vector.shape_cast %16 : vector<1x4x288xf32> to vector<4x288xf32>
    %c0_18 = arith.constant 0 : index
    %c12_19 = arith.constant 12 : index
    %c19 = arith.constant 19 : index
    %18 = vector.load %arg8[%c0_18, %c12_19, %c19] : memref<1x16x326xf32, #tpu.memory_space<vmem>>, vector<1x4x288xf32>
    %19 = vector.shape_cast %18 : vector<1x4x288xf32> to vector<4x288xf32>
    %c0_20 = arith.constant 0 : index
    %c12_21 = arith.constant 12 : index
    %c20 = arith.constant 20 : index
    %20 = vector.load %arg8[%c0_20, %c12_21, %c20] : memref<1x16x326xf32, #tpu.memory_space<vmem>>, vector<1x4x288xf32>
    %21 = vector.shape_cast %20 : vector<1x4x288xf32> to vector<4x288xf32>
    %c0_22 = arith.constant 0 : index
    %c12_23 = arith.constant 12 : index
    %c36 = arith.constant 36 : index
    %22 = vector.load %arg8[%c0_22, %c12_23, %c36] : memref<1x16x326xf32, #tpu.memory_space<vmem>>, vector<1x4x288xf32>
    %23 = vector.shape_cast %22 : vector<1x4x288xf32> to vector<4x288xf32>
    %c0_24 = arith.constant 0 : index
    %c12_25 = arith.constant 12 : index
    %c37 = arith.constant 37 : index
    %24 = vector.load %arg8[%c0_24, %c12_25, %c37] : memref<1x16x326xf32, #tpu.memory_space<vmem>>, vector<1x4x288xf32>
    %25 = vector.shape_cast %24 : vector<1x4x288xf32> to vector<4x288xf32>
    %c0_26 = arith.constant 0 : index
    %c12_27 = arith.constant 12 : index
    %c38 = arith.constant 38 : index
    %26 = vector.load %arg8[%c0_26, %c12_27, %c38] : memref<1x16x326xf32, #tpu.memory_space<vmem>>, vector<1x4x288xf32>
    %27 = vector.shape_cast %26 : vector<1x4x288xf32> to vector<4x288xf32>
    %28 = tpu.concatenate %11, %13, %15, %17, %19, %21, %23, %25, %27 in 0 : vector<4x288xf32>, vector<4x288xf32>, vector<4x288xf32>, vector<4x288xf32>, vector<4x288xf32>, vector<4x288xf32>, vector<4x288xf32>, vector<4x288xf32>, vector<4x288xf32> -> vector<36x288xf32>
    %29 = arith.truncf %28 : vector<36x288xf32> to vector<36x288xbf16>
    %c0_28 = arith.constant 0 : index
    %c0_29 = arith.constant 0 : index
    %30 = vector.load %arg3[%c0_28, %c0_29] : memref<4x36xbf16, #tpu.memory_space<vmem>>, vector<4x36xbf16>
    %cst_30 = arith.constant dense<0.000000e+00> : vector<4x288xf32>
    %31 = tpu.matmul %30, %29, %cst_30 {dimension_numbers = #tpu.dot_dimension_numbers<[1], [0], [0], [1], [0, 0, 1, 1], [], []>} : vector<4x36xbf16>, vector<36x288xbf16>, vector<4x288xf32> -> vector<4x288xf32>
    %c0_31 = arith.constant 0 : index
    %c0_32 = arith.constant 0 : index
    %c0_33 = arith.constant 0 : index
    %32 = vector.load %arg6[%c0_31, %c0_32, %c0_33] : memref<3x4x1xf32, #tpu.memory_space<vmem>>, vector<1x4x1xf32>
    %33 = vector.shape_cast %32 : vector<1x4x1xf32> to vector<4x1xf32>
    %34 = vector.broadcast %33 : vector<4x1xf32> to vector<4x288xf32>
    %35 = arith.mulf %31, %34 : vector<4x288xf32>
    %c0_34 = arith.constant 0 : index
    %c0_35 = arith.constant 0 : index
    %c0_36 = arith.constant 0 : index
    %36 = vector.load %arg7[%c0_34, %c0_35, %c0_36] : memref<3x4x1xf32, #tpu.memory_space<vmem>>, vector<1x4x1xf32>
    %37 = vector.shape_cast %36 : vector<1x4x1xf32> to vector<4x1xf32>
    %38 = vector.broadcast %37 : vector<4x1xf32> to vector<4x288xf32>
    %39 = arith.addf %35, %38 : vector<4x288xf32>
    %cst_37 = arith.constant 0.000000e+00 : f32
    %40 = vector.broadcast %cst_37 : f32 to vector<4x288xf32>
    %41 = arith.maximumf %39, %40 : vector<4x288xf32>
    %42 = vector.broadcast %9 : vector<1x288xf32> to vector<4x288xf32>
    %43 = arith.mulf %41, %42 : vector<4x288xf32>
    %c0_38 = arith.constant 0 : index
    %c8 = arith.constant 8 : index
    %c19_39 = arith.constant 19 : index
    %44 = vector.load %arg8[%c0_38, %c8, %c19_39] : memref<1x16x326xf32, #tpu.memory_space<vmem>>, vector<1x4x288xf32>
    %45 = vector.shape_cast %44 : vector<1x4x288xf32> to vector<4x288xf32>
    %46 = vector.shape_cast %43 : vector<4x288xf32> to vector<1x4x288xf32>
    tpu.vector_store %arg8[%c0_38, %c8, %c19_39], %46 {strides = array<i32>} : memref<1x16x326xf32, #tpu.memory_space<vmem>>, vector<1x4x288xf32>,
    %c0_40 = arith.constant 0 : index
    %c8_41 = arith.constant 8 : index
    %c0_42 = arith.constant 0 : index
    %47 = vector.load %arg8[%c0_40, %c8_41, %c0_42] : memref<1x16x326xf32, #tpu.memory_space<vmem>>, vector<1x8x288xf32>
    %48 = vector.shape_cast %47 : vector<1x8x288xf32> to vector<8x288xf32>
    %c0_43 = arith.constant 0 : index
    %c8_44 = arith.constant 8 : index
    %c1_45 = arith.constant 1 : index
    %49 = vector.load %arg8[%c0_43, %c8_44, %c1_45] : memref<1x16x326xf32, #tpu.memory_space<vmem>>, vector<1x8x288xf32>
    %50 = vector.shape_cast %49 : vector<1x8x288xf32> to vector<8x288xf32>
    %c0_46 = arith.constant 0 : index
    %c8_47 = arith.constant 8 : index
    %c2_48 = arith.constant 2 : index
    %51 = vector.load %arg8[%c0_46, %c8_47, %c2_48] : memref<1x16x326xf32, #tpu.memory_space<vmem>>, vector<1x8x288xf32>
    %52 = vector.shape_cast %51 : vector<1x8x288xf32> to vector<8x288xf32>
    %c0_49 = arith.constant 0 : index
    %c8_50 = arith.constant 8 : index
    %c18_51 = arith.constant 18 : index
    %53 = vector.load %arg8[%c0_49, %c8_50, %c18_51] : memref<1x16x326xf32, #tpu.memory_space<vmem>>, vector<1x8x288xf32>
    %54 = vector.shape_cast %53 : vector<1x8x288xf32> to vector<8x288xf32>
    %c0_52 = arith.constant 0 : index
    %c8_53 = arith.constant 8 : index
    %c19_54 = arith.constant 19 : index
    %55 = vector.load %arg8[%c0_52, %c8_53, %c19_54] : memref<1x16x326xf32, #tpu.memory_space<vmem>>, vector<1x8x288xf32>
    %56 = vector.shape_cast %55 : vector<1x8x288xf32> to vector<8x288xf32>
    %c0_55 = arith.constant 0 : index
    %c8_56 = arith.constant 8 : index
    %c20_57 = arith.constant 20 : index
    %57 = vector.load %arg8[%c0_55, %c8_56, %c20_57] : memref<1x16x326xf32, #tpu.memory_space<vmem>>, vector<1x8x288xf32>
    %58 = vector.shape_cast %57 : vector<1x8x288xf32> to vector<8x288xf32>
    %c0_58 = arith.constant 0 : index
    %c8_59 = arith.constant 8 : index
    %c36_60 = arith.constant 36 : index
    %59 = vector.load %arg8[%c0_58, %c8_59, %c36_60] : memref<1x16x326xf32, #tpu.memory_space<vmem>>, vector<1x8x288xf32>
    %60 = vector.shape_cast %59 : vector<1x8x288xf32> to vector<8x288xf32>
    %c0_61 = arith.constant 0 : index
    %c8_62 = arith.constant 8 : index
    %c37_63 = arith.constant 37 : index
    %61 = vector.load %arg8[%c0_61, %c8_62, %c37_63] : memref<1x16x326xf32, #tpu.memory_space<vmem>>, vector<1x8x288xf32>
    %62 = vector.shape_cast %61 : vector<1x8x288xf32> to vector<8x288xf32>
    %c0_64 = arith.constant 0 : index
    %c8_65 = arith.constant 8 : index
    %c38_66 = arith.constant 38 : index
    %63 = vector.load %arg8[%c0_64, %c8_65, %c38_66] : memref<1x16x326xf32, #tpu.memory_space<vmem>>, vector<1x8x288xf32>
    %64 = vector.shape_cast %63 : vector<1x8x288xf32> to vector<8x288xf32>
    %65 = tpu.concatenate %48, %50, %52, %54, %56, %58, %60, %62, %64 in 0 : vector<8x288xf32>, vector<8x288xf32>, vector<8x288xf32>, vector<8x288xf32>, vector<8x288xf32>, vector<8x288xf32>, vector<8x288xf32>, vector<8x288xf32>, vector<8x288xf32> -> vector<72x288xf32>
    %66 = arith.truncf %65 : vector<72x288xf32> to vector<72x288xbf16>
    %c0_67 = arith.constant 0 : index
    %c0_68 = arith.constant 0 : index
    %67 = vector.load %arg4[%c0_67, %c0_68] : memref<4x72xbf16, #tpu.memory_space<vmem>>, vector<4x72xbf16>
    %cst_69 = arith.constant dense<0.000000e+00> : vector<4x288xf32>
    %68 = tpu.matmul %67, %66, %cst_69 {dimension_numbers = #tpu.dot_dimension_numbers<[1], [0], [0], [1], [0, 0, 1, 1], [], []>} : vector<4x72xbf16>, vector<72x288xbf16>, vector<4x288xf32> -> vector<4x288xf32>
    %c1_70 = arith.constant 1 : index
    %c0_71 = arith.constant 0 : index
    %c0_72 = arith.constant 0 : index
    %69 = vector.load %arg6[%c1_70, %c0_71, %c0_72] : memref<3x4x1xf32, #tpu.memory_space<vmem>>, vector<1x4x1xf32>
    %70 = vector.shape_cast %69 : vector<1x4x1xf32> to vector<4x1xf32>
    %71 = vector.broadcast %70 : vector<4x1xf32> to vector<4x288xf32>
    %72 = arith.mulf %68, %71 : vector<4x288xf32>
    %c1_73 = arith.constant 1 : index
    %c0_74 = arith.constant 0 : index
    %c0_75 = arith.constant 0 : index
    %73 = vector.load %arg7[%c1_73, %c0_74, %c0_75] : memref<3x4x1xf32, #tpu.memory_space<vmem>>, vector<1x4x1xf32>
    %74 = vector.shape_cast %73 : vector<1x4x1xf32> to vector<4x1xf32>
    %75 = vector.broadcast %74 : vector<4x1xf32> to vector<4x288xf32>
    %76 = arith.addf %72, %75 : vector<4x288xf32>
    %cst_76 = arith.constant 0.000000e+00 : f32
    %77 = vector.broadcast %cst_76 : f32 to vector<4x288xf32>
    %78 = arith.maximumf %76, %77 : vector<4x288xf32>
    %79 = vector.broadcast %9 : vector<1x288xf32> to vector<4x288xf32>
    %80 = arith.mulf %78, %79 : vector<4x288xf32>
    %c0_77 = arith.constant 0 : index
    %c4 = arith.constant 4 : index
    %c19_78 = arith.constant 19 : index
    %81 = vector.load %arg8[%c0_77, %c4, %c19_78] : memref<1x16x326xf32, #tpu.memory_space<vmem>>, vector<1x4x288xf32>
    %82 = vector.shape_cast %81 : vector<1x4x288xf32> to vector<4x288xf32>
    %83 = vector.shape_cast %80 : vector<4x288xf32> to vector<1x4x288xf32>
    tpu.vector_store %arg8[%c0_77, %c4, %c19_78], %83 {strides = array<i32>} : memref<1x16x326xf32, #tpu.memory_space<vmem>>, vector<1x4x288xf32>,
    %c0_79 = arith.constant 0 : index
    %c4_80 = arith.constant 4 : index
    %c0_81 = arith.constant 0 : index
    %84 = vector.load %arg8[%c0_79, %c4_80, %c0_81] : memref<1x16x326xf32, #tpu.memory_space<vmem>>, vector<1x12x288xf32>
    %85 = vector.shape_cast %84 : vector<1x12x288xf32> to vector<12x288xf32>
    %c0_82 = arith.constant 0 : index
    %c4_83 = arith.constant 4 : index
    %c1_84 = arith.constant 1 : index
    %86 = vector.load %arg8[%c0_82, %c4_83, %c1_84] : memref<1x16x326xf32, #tpu.memory_space<vmem>>, vector<1x12x288xf32>
    %87 = vector.shape_cast %86 : vector<1x12x288xf32> to vector<12x288xf32>
    %c0_85 = arith.constant 0 : index
    %c4_86 = arith.constant 4 : index
    %c2_87 = arith.constant 2 : index
    %88 = vector.load %arg8[%c0_85, %c4_86, %c2_87] : memref<1x16x326xf32, #tpu.memory_space<vmem>>, vector<1x12x288xf32>
    %89 = vector.shape_cast %88 : vector<1x12x288xf32> to vector<12x288xf32>
    %c0_88 = arith.constant 0 : index
    %c4_89 = arith.constant 4 : index
    %c18_90 = arith.constant 18 : index
    %90 = vector.load %arg8[%c0_88, %c4_89, %c18_90] : memref<1x16x326xf32, #tpu.memory_space<vmem>>, vector<1x12x288xf32>
    %91 = vector.shape_cast %90 : vector<1x12x288xf32> to vector<12x288xf32>
    %c0_91 = arith.constant 0 : index
    %c4_92 = arith.constant 4 : index
    %c19_93 = arith.constant 19 : index
    %92 = vector.load %arg8[%c0_91, %c4_92, %c19_93] : memref<1x16x326xf32, #tpu.memory_space<vmem>>, vector<1x12x288xf32>
    %93 = vector.shape_cast %92 : vector<1x12x288xf32> to vector<12x288xf32>
    %c0_94 = arith.constant 0 : index
    %c4_95 = arith.constant 4 : index
    %c20_96 = arith.constant 20 : index
    %94 = vector.load %arg8[%c0_94, %c4_95, %c20_96] : memref<1x16x326xf32, #tpu.memory_space<vmem>>, vector<1x12x288xf32>
    %95 = vector.shape_cast %94 : vector<1x12x288xf32> to vector<12x288xf32>
    %c0_97 = arith.constant 0 : index
    %c4_98 = arith.constant 4 : index
    %c36_99 = arith.constant 36 : index
    %96 = vector.load %arg8[%c0_97, %c4_98, %c36_99] : memref<1x16x326xf32, #tpu.memory_space<vmem>>, vector<1x12x288xf32>
    %97 = vector.shape_cast %96 : vector<1x12x288xf32> to vector<12x288xf32>
    %c0_100 = arith.constant 0 : index
    %c4_101 = arith.constant 4 : index
    %c37_102 = arith.constant 37 : index
    %98 = vector.load %arg8[%c0_100, %c4_101, %c37_102] : memref<1x16x326xf32, #tpu.memory_space<vmem>>, vector<1x12x288xf32>
    %99 = vector.shape_cast %98 : vector<1x12x288xf32> to vector<12x288xf32>
    %c0_103 = arith.constant 0 : index
    %c4_104 = arith.constant 4 : index
    %c38_105 = arith.constant 38 : index
    %100 = vector.load %arg8[%c0_103, %c4_104, %c38_105] : memref<1x16x326xf32, #tpu.memory_space<vmem>>, vector<1x12x288xf32>
    %101 = vector.shape_cast %100 : vector<1x12x288xf32> to vector<12x288xf32>
    %102 = tpu.concatenate %85, %87, %89, %91, %93, %95, %97, %99, %101 in 0 : vector<12x288xf32>, vector<12x288xf32>, vector<12x288xf32>, vector<12x288xf32>, vector<12x288xf32>, vector<12x288xf32>, vector<12x288xf32>, vector<12x288xf32>, vector<12x288xf32> -> vector<108x288xf32>
    %103 = arith.truncf %102 : vector<108x288xf32> to vector<108x288xbf16>
    %c0_106 = arith.constant 0 : index
    %c0_107 = arith.constant 0 : index
    %104 = vector.load %arg5[%c0_106, %c0_107] : memref<4x108xbf16, #tpu.memory_space<vmem>>, vector<4x108xbf16>
    %cst_108 = arith.constant dense<0.000000e+00> : vector<4x288xf32>
    %105 = tpu.matmul %104, %103, %cst_108 {dimension_numbers = #tpu.dot_dimension_numbers<[1], [0], [0], [1], [0, 0, 1, 1], [], []>} : vector<4x108xbf16>, vector<108x288xbf16>, vector<4x288xf32> -> vector<4x288xf32>
    %c2_109 = arith.constant 2 : index
    %c0_110 = arith.constant 0 : index
    %c0_111 = arith.constant 0 : index
    %106 = vector.load %arg6[%c2_109, %c0_110, %c0_111] : memref<3x4x1xf32, #tpu.memory_space<vmem>>, vector<1x4x1xf32>
    %107 = vector.shape_cast %106 : vector<1x4x1xf32> to vector<4x1xf32>
    %108 = vector.broadcast %107 : vector<4x1xf32> to vector<4x288xf32>
    %109 = arith.mulf %105, %108 : vector<4x288xf32>
    %c2_112 = arith.constant 2 : index
    %c0_113 = arith.constant 0 : index
    %c0_114 = arith.constant 0 : index
    %110 = vector.load %arg7[%c2_112, %c0_113, %c0_114] : memref<3x4x1xf32, #tpu.memory_space<vmem>>, vector<1x4x1xf32>
    %111 = vector.shape_cast %110 : vector<1x4x1xf32> to vector<4x1xf32>
    %112 = vector.broadcast %111 : vector<4x1xf32> to vector<4x288xf32>
    %113 = arith.addf %109, %112 : vector<4x288xf32>
    %cst_115 = arith.constant 0.000000e+00 : f32
    %114 = vector.broadcast %cst_115 : f32 to vector<4x288xf32>
    %115 = arith.maximumf %113, %114 : vector<4x288xf32>
    %116 = vector.broadcast %9 : vector<1x288xf32> to vector<4x288xf32>
    %117 = arith.mulf %115, %116 : vector<4x288xf32>
    %c0_116 = arith.constant 0 : index
    %c0_117 = arith.constant 0 : index
    %c19_118 = arith.constant 19 : index
    %118 = vector.load %arg8[%c0_116, %c0_117, %c19_118] : memref<1x16x326xf32, #tpu.memory_space<vmem>>, vector<1x4x288xf32>
    %119 = vector.shape_cast %118 : vector<1x4x288xf32> to vector<4x288xf32>
    %120 = vector.shape_cast %117 : vector<4x288xf32> to vector<1x4x288xf32>
    tpu.vector_store %arg8[%c0_116, %c0_117, %c19_118], %120 {strides = array<i32>} : memref<1x16x326xf32, #tpu.memory_space<vmem>>, vector<1x4x288xf32>,
    return
  }
  func.func @transform_0(%arg0: i32) -> (i32, i32, i32) {
    %c0_i32 = arith.constant 0 : i32
    %c0_i32_0 = arith.constant 0 : i32
    %c0_i32_1 = arith.constant 0 : i32
    return %arg0, %c0_i32, %c0_i32_0 : i32, i32, i32
  }
  func.func @transform_1(%arg0: i32) -> (i32, i32) {
    %c0_i32 = arith.constant 0 : i32
    %c0_i32_0 = arith.constant 0 : i32
    %c0_i32_1 = arith.constant 0 : i32
    return %c0_i32, %c0_i32_0 : i32, i32
  }
  func.func @transform_2(%arg0: i32) -> (i32, i32) {
    %c0_i32 = arith.constant 0 : i32
    %c0_i32_0 = arith.constant 0 : i32
    %c0_i32_1 = arith.constant 0 : i32
    return %c0_i32, %c0_i32_0 : i32, i32
  }
  func.func @transform_3(%arg0: i32) -> (i32, i32) {
    %c0_i32 = arith.constant 0 : i32
    %c0_i32_0 = arith.constant 0 : i32
    %c0_i32_1 = arith.constant 0 : i32
    return %c0_i32, %c0_i32_0 : i32, i32
  }
  func.func @transform_4(%arg0: i32) -> (i32, i32) {
    %c0_i32 = arith.constant 0 : i32
    %c0_i32_0 = arith.constant 0 : i32
    %c0_i32_1 = arith.constant 0 : i32
    return %c0_i32, %c0_i32_0 : i32, i32
  }
  func.func @transform_5(%arg0: i32) -> (i32, i32, i32) {
    %c0_i32 = arith.constant 0 : i32
    %c0_i32_0 = arith.constant 0 : i32
    %c0_i32_1 = arith.constant 0 : i32
    %c0_i32_2 = arith.constant 0 : i32
    return %c0_i32, %c0_i32_0, %c0_i32_1 : i32, i32, i32
  }
  func.func @transform_6(%arg0: i32) -> (i32, i32, i32) {
    %c0_i32 = arith.constant 0 : i32
    %c0_i32_0 = arith.constant 0 : i32
    %c0_i32_1 = arith.constant 0 : i32
    %c0_i32_2 = arith.constant 0 : i32
    return %c0_i32, %c0_i32_0, %c0_i32_1 : i32, i32, i32
  }
  func.func @transform_7(%arg0: i32) -> (i32, i32, i32) {
    %c0_i32 = arith.constant 0 : i32
    %c0_i32_0 = arith.constant 0 : i32
    %c0_i32_1 = arith.constant 0 : i32
    return %arg0, %c0_i32, %c0_i32_0 : i32, i32, i32
  }
}

</mosaic_0001>

<bundles_post_ra>
// kernel: denseblock_forward_nchw.1
= control target key start
LH: loop header
LB: loop body
LE: loop exit
PB: predicated region body
PF: predicated region fallthrough
CT: control target
= control target key end

     0   :  { %s1634_s24 = smov 0   ;;  %s2058_s0 = inlined_call_operand.vmem [shape: f32[2,4,326], index: 0, kind: input, shape index: {}]   ;;  %s2059_s1 = inlined_call_operand.vmem [shape: f32[1,288], index: 1, kind: input, shape index: {}]   ;;  %s2060_s2 = inlined_call_operand.vmem [shape: bf16[4,36], index: 2, kind: input, shape index: {}]   ;;  %s2061_s3 = inlined_call_operand.vmem [shape: bf16[4,72], index: 3, kind: input, shape index: {}]   ;;  %s2062_s4 = inlined_call_operand.vmem [shape: bf16[4,108], index: 4, kind: input, shape index: {}]   ;;  %s2063_s5 = inlined_call_operand.vmem [shape: f32[3,4,1], index: 5, kind: input, shape index: {}]   ;;  %s2064_s6 = inlined_call_operand.vmem [shape: f32[3,4,1], index: 6, kind: input, shape index: {}]   ;;  %s2065_s7 = inlined_call_operand.vmem [shape: f32[2,16,326], index: 7, kind: output, shape index: {}]  }
   0x1 LB: > { %s1267_s25 = sadd.s32 4294967295, %s1580_s24   ;;  %p1271_p0 = scmp.ge.s32.totalorder %s1580_s24, 1  ;;  %s1580_s24 = sphi %s1634_s24, %s17_s24  }
   0x2   : > { %p237_p1 = scmp.lt.s32.totalorder %s1580_s24, 3 }
   0x4   : > { %p238_p2 = pnand %p1271_p0, %p237_p1 }
   0x5   : > { %p269_p3 = scmp.lt.s32.totalorder (!%p238_p2), %s1267_s25, 1  ;;  %s1583_s11 = smov (!%p238_p2), 127  }
   0x6   : > { %241 = sbr.rel (%p238_p2) target bundleno = 1469 (0x5bd), region = 48  ;;  %s1584_s12 = smov (!%p238_p2), 108  }
   0x7   : > { %s1585_s13 = smov (!%p238_p2), 91   ;;  %s1586_s14 = smov (!%p238_p2), 90  }
   0x8   : > { %s1587_s15 = smov (!%p238_p2), 92   ;;  %s1588_s16 = smov (!%p238_p2), 109  }
   0x9   : > { %s1589_s17 = smov (!%p238_p2), 126   ;;  %s1592_s18 = smov (!%p238_p2), 110  }
   0xa   : > { %s1593_s28 = smov (!%p238_p2), 19  }
   0xb   : > { %v1582_v0 = vmov 0.0   ;;  %s2067_s25 = smov (!%p269_p3, %s1267_s25), 1  ;;  %vm282_vm0 = vcmask 572416   ;;  %vm297_vm1 = vcmask 572420   ;;  %v1590_v13 = vmov 0  }
   0xc   : > { %1307 = vmatprep.subr.bf16.mxu1 %v1582_v0  ;;  %s1349_s26 = smul.u32 12, %s2067_s25  ;;  %477 = vmatprep.mubr.bf16.mxu0 %v1590_v13  ;;  %vm1591_vm2 = vmmov 0   ;;  %v526_v14 = vld [vmem:[%s2063_s5] sm:$0xf]  ;;  %vm402_vm3 = vcmask 736256   ;;  %vm435_vm4 = vcmask 1041408  }
   0xd   : > { %s1350_s27 = smul.u32 48, %s2067_s25  ;;  %1313 = vmatprep.mubr.msk.bf16.mxu1 %vm1591_vm2, %v1582_v0  ;;  %1411 = vset.pattern.permute.xlu0 %v1590_v13  ;;  %v535_v15 = vld [vmem:[%s2064_s6] sm:$0xf]  ;;  %vm378_vm5 = vcmask 752640   ;;  %vm366_vm6 = vcmask 883712   ;;  %vm390_vm7 = vcmask 744448  }
   0xe   : > { %s273_s30 = scalar_lea.vmem %s2058_s0, %s1349_s26  ;;  %1412 = vset.pattern.permute.xlu1 %v1590_v13  ;;  %vm354_vm8 = vcmask 891904   ;;  %vm408_vm9 = vcmask 1043456   ;;  %vm318_vm10 = vcmask 1039360   ;;  %vm330_vm11 = vcmask 1031168  }
   0xf   : > { %s1649_s10 = scalar_lea.vmem %s2065_s7, %s1350_s27  ;;  %v287_v1 = vld [vmem:[%s273_s30] sm:$0xff]  ;;  %v1573_v2 = vld [vmem:[%s273_s30 + $0x8] ss:$0 sps:$4 sm:$0xff]   ;;  %vm342_vm12 = vcmask 900096   ;;  %vm431_vm13 = vcmask 293888   ;;  %vm581_vm14 = vcmask 1043608  }
  0x10   : > { %284 = vst [vmem:[%s1649_s10 + $0x18] sm:$0xff] %v1582_v0  ;;  %285 = vst [vmem:[%s1649_s10 + $0x20] sm:$0xff] %v1582_v0  ;;  %v291_v3 = vcombine.low %v287_v1, %v287_v1  ;;  %vm575_vm15 = vcmask 154624  }
  0x11   : > { %286 = vst.msk [vmem:[%s1649_s10 + $0x28] sm:$0xff] %vm282_vm0, %v1582_v0  ;;  %280 = vst [vmem:[%s1649_s10] sm:$0xff] %v1582_v0 }
  0x12   : > { %281 = vst [vmem:[%s1649_s10 + $0x8] sm:$0xff] %v1582_v0  ;;  %283 = vst.msk [vmem:[%s1649_s10 + $0x10] sm:$0xff] %vm282_vm0, %v1582_v0  ;;  %vm584_vm0 = vcmask 412672  }
  0x13   : > { %296 = vst [vmem:[%s1649_s10 + $0x20] sm:$0xf0] %v287_v1  ;;  %298 = vst.msk [vmem:[%s1649_s10 + $0x28] sm:$0xf0] %vm297_vm1, %v1573_v2  ;;  %vm696_vm1 = vcmask 588800  }
  0x14   : > { %295 = vst [vmem:[%s1649_s10 + $0x18] sm:$0xf0] %v291_v3 }
  0x1a   : > { %v301_v4 = vld [vmem:[%s1649_s10 + $0x20] sm:$0xf0]  ;;  %v302_v5 = vld [vmem:[%s1649_s10 + $0x28] sm:$0xf0] }
  0x1b   : > { %v1381_v6 = vpack.i.bf16 %v302_v5, %v301_v4  ;;  %v1668_v7 = vrot.slane %v301_v4, 4  ;;  %v300_v8 = vld [vmem:[%s1649_s10 + $0x18] sm:$0xf0]  ;;  %v1679_v11 = vrot.slane %v302_v5, 4 }
  0x1c   : > { %v1671_v9 = vrot.slane %v300_v8, 4 }
  0x1d   : > { %1382 = vrot.lane.b32.xlu0 %v1381_v6, %s1583_s11  ;;  %1372 = vrot.lane.b32.xlu1 %v1381_v6, %s1584_s12  ;;  %v1396_v12 = vpack.i.bf16 %v1679_v11, %v1668_v7 }
  0x1e   : > { %v1386_v10 = vpack.i.bf16 %v1668_v7, %v1671_v9 }
  0x21   : > { %1377 = vrot.lane.b32.xlu1 %v1381_v6, %s1585_s13  ;;  %1387 = vrot.lane.b32.xlu0 %v1386_v10, %s1586_s14 }
  0x25   : > { %360 = vrot.lane.b32.xlu1 %v300_v8, %s1584_s12  ;;  %400 = vrot.lane.b32.xlu0 %v1679_v11, %s1586_s14 }
  0x29   : > { %384 = vrot.lane.b32.xlu1 %v300_v8, %s1585_s13  ;;  %1397 = vrot.lane.b32.xlu0 %v1396_v12, %s1587_s15 }
  0x2d   : > { %1392 = vrot.lane.b32.xlu1 %v1396_v12, %s1588_s16  ;;  %348 = vrot.lane.b32.xlu0 %v1671_v9, %s1588_s16 }
  0x31   : > { %1407 = vrot.lane.b32.xlu1 %v1396_v12, %s1589_s17  ;;  %372 = vrot.lane.b32.xlu0 %v1671_v9, %s1587_s15 }
  0x35   : > { %312 = vrot.lane.b32.xlu1 %v300_v8, %s1583_s11  ;;  %1402 = vrot.lane.b32.xlu0 %v1381_v6, %s1592_s18 }
  0x39   : > { %336 = vrot.lane.b32.xlu1 %v300_v8, %s1592_s18  ;;  %324 = vrot.lane.b32.xlu0 %v1671_v9, %s1589_s17 }
  0x3d   : > { %529 = vperm.xlu0 %1411, %v526_v14   ;;  %538 = vperm.xlu1 %1412, %v535_v15  }
  0x8f   : > { %v1710_v16 = vpop.permute.xlu0 %1382  ;;  %v1373_v17 = vpop.permute.xlu1 %1372 }
  0x90   : > { %v1375_v35 = vunpack.i.h.bf16 %v1373_v17  ;;  %v1374_v36 = vunpack.i.l.bf16 %v1373_v17  ;;  %v1385_v44 = vunpack.i.h.bf16 %v1710_v16  ;;  %v1384_v51 = vunpack.i.l.bf16 %v1710_v16 }
  0x92   : > { %v368_v45 = vsel %vm366_vm6, %v1374_v36, %v1375_v35  ;;  %v320_v5 = vsel %vm318_vm10, %v1384_v51, %v1385_v44  ;;  %v411_v10 = vsel %vm408_vm9, %v1679_v11, %v1385_v44 }
  0x93   : > { %v1378_v18 = vpop.permute.xlu1 %1377  ;;  %v1388_v19 = vpop.permute.xlu0 %1387 }
  0x94   : > { %v1390_v20 = vunpack.i.h.bf16 %v1388_v19  ;;  %v1389_v21 = vunpack.i.l.bf16 %v1388_v19  ;;  %v1380_v37 = vunpack.i.h.bf16 %v1378_v18  ;;  %v1379_v38 = vunpack.i.l.bf16 %v1378_v18 }
  0x96   : > { %v403_v22 = vsel %vm402_vm3, %v1389_v21, %v1390_v20  ;;  %v392_v46 = vsel %vm390_vm7, %v1379_v38, %v1380_v37 }
  0x97   : > { %v361_v23 = vpop.permute.xlu1 %360  ;;  %v401_v24 = vpop.permute.xlu0 %400  ;;  %v427_v25 = vpack.c.bf16 %v403_v22, %v403_v22 }
  0x98   : > { %v429_v26 = vpack.c.bf16 %v401_v24, %v401_v24  ;;  %v404_v27 = vsel %vm402_vm3, %v1390_v20, %v401_v24  ;;  %v367_v57 = vsel %vm366_vm6, %v361_v23, %v1374_v36  ;;  %v410_v20 = vsel %vm408_vm9, %v1668_v7, %v320_v5  ;;  %v1280_v5 = vld [vmem:[%s2063_s5 + $0x4] sm:$0xf] }
  0x99   : > { %v428_v28 = vpack.c.bf16 %v404_v27, %v404_v27  ;;  %v437_v32 = vsel %vm435_vm4, %v427_v25, 0 }
  0x9a   : > { %v443_v29 = vsel %vm435_vm4, %v429_v26, 0  ;;  %v430_v26 = vld [vmem:[%s2060_s2] sm:$0x3] }
  0x9b   : > { %v385_v30 = vpop.permute.xlu1 %384  ;;  %1308 = vmatpush3.bf16.msra.mxu1 %v443_v29  ;;  %v1398_v31 = vpop.permute.xlu0 %1397  ;;  %1274 = vmatprep.subr.msk.bf16.mxu0 %vm435_vm4, %v428_v28  ;;  %vm836_vm4 = vcmask 416772  }
  0x9c   : > { %v1400_v33 = vunpack.i.h.bf16 %v1398_v31  ;;  %v1399_v34 = vunpack.i.l.bf16 %v1398_v31  ;;  %456 = vmatpush1.bf16.msra.mxu0 %v437_v32  ;;  %1309 = vmatprep.subr.bf16.mxu1 %v1582_v0  ;;  %v391_v58 = vsel %vm390_vm7, %v385_v30, %v1379_v38 }
  0x9e   : > { %v380_v41 = vsel %vm378_vm5, %v1399_v34, %v1400_v33  ;;  %v420_v50 = vsel %vm408_vm9, %v1400_v33, %v1380_v37 }
  0x9f   : > { %v1393_v39 = vpop.permute.xlu1 %1392  ;;  %v349_v40 = vpop.permute.xlu0 %348  ;;  %v419_v56 = vsel %vm408_vm9, %v380_v41, %v392_v46 }
  0xa0   : > { %v1395_v42 = vunpack.i.h.bf16 %v1393_v39  ;;  %v1394_v43 = vunpack.i.l.bf16 %v1393_v39 }
  0xa2   : > { %v356_v47 = vsel %vm354_vm8, %v1394_v43, %v1395_v42  ;;  %v355_v48 = vsel %vm354_vm8, %v349_v40, %v1394_v43  ;;  %v417_v49 = vsel %vm408_vm9, %v1395_v42, %v1375_v35  ;;  %v299_v35 = vld [vmem:[%s2059_s1] sm:$0x7] }
  0xa3   : > { %v1408_v52 = vpop.permute.xlu1 %1407  ;;  %v373_v53 = vpop.permute.xlu0 %372  ;;  %v426_v54 = vpack.c.bf16 %v420_v50, %v417_v49  ;;  %v416_v55 = vsel %vm408_vm9, %v356_v47, %v368_v45  ;;  %v415_v61 = vsel %vm408_vm9, %v355_v48, %v367_v57 }
  0xa4   : > { %v379_v59 = vsel %vm378_vm5, %v373_v53, %v1399_v34  ;;  %v425_v60 = vpack.c.bf16 %v419_v56, %v416_v55  ;;  %v1410_v63 = vunpack.i.h.bf16 %v1408_v52  ;;  %v1409_v1 = vunpack.i.l.bf16 %v1408_v52 }
  0xa5   : > { %v418_v62 = vsel %vm408_vm9, %v379_v59, %v391_v58  ;;  %1310 = vmatpush3.bf16.msra.mxu1 %v426_v54 }
  0xa6   : > { %457 = vmatprep.subr.bf16.mxu0 %v425_v60  ;;  %v424_v2 = vpack.c.bf16 %v418_v62, %v415_v61  ;;  %1311 = vmatprep.subr.bf16.mxu1 %v1582_v0  ;;  %v332_v12 = vsel %vm330_vm11, %v1409_v1, %v1410_v63 }
  0xa7   : > { %v313_v3 = vpop.permute.xlu1 %312  ;;  %v1403_v4 = vpop.permute.xlu0 %1402 }
  0xa8   : > { %v1405_v6 = vunpack.i.h.bf16 %v1403_v4  ;;  %v1404_v8 = vunpack.i.l.bf16 %v1403_v4  ;;  %458 = vmatpush1.bf16.msra.mxu0 %v424_v2  ;;  %v319_v14 = vsel %vm318_vm10, %v313_v3, %v1384_v51  ;;  %v1281_v4 = vld [vmem:[%s2064_s6 + $0x4] sm:$0xf] }
  0xa9   : > { %v409_v24 = vsel %vm408_vm9, %v1671_v9, %v319_v14  ;;  %v548_v9 = vlaneseq }
  0xaa   : > { %v344_v15 = vsel %vm342_vm12, %v1404_v8, %v1405_v6  ;;  %v414_v16 = vsel %vm408_vm9, %v1410_v63, %v1405_v6 }
  0xab   : > { %v337_v17 = vpop.permute.xlu1 %336  ;;  %v325_v18 = vpop.permute.xlu0 %324  ;;  %v423_v19 = vpack.c.bf16 %v414_v16, %v411_v10  ;;  %v413_v21 = vsel %vm408_vm9, %v332_v12, %v344_v15  ;;  %v549_v27 = vshrl.u32 %v548_v9, 7 }
  0xac   : > { %v343_v22 = vsel %vm342_vm12, %v337_v17, %v1404_v8  ;;  %v331_v11 = vsel %vm330_vm11, %v325_v18, %v1409_v1  ;;  %v422_v23 = vpack.c.bf16 %v413_v21, %v410_v20 }
  0xad   : > { %v412_v25 = vsel %vm408_vm9, %v331_v11, %v343_v22  ;;  %1312 = vmatpush3.bf16.msra.mxu1 %v423_v19  ;;  %v550_v32 = vsub.s32 0, %v549_v27  ;;  %v554_v38 = vsub.s32 1, %v549_v27  ;;  %v558_v40 = vsub.s32 2, %v549_v27 }
  0xae   : > { %459 = vmatprep.subr.bf16.mxu0 %v422_v23  ;;  %v421_v7 = vpack.c.bf16 %v412_v25, %v409_v24  ;;  %1317 = vmatprep.subr.bf16.mxu1 %v1582_v0 }
  0xaf   : > { %v1757_v44 = vrot.slane %v299_v35, %v550_v32  ;;  %v1759_v49 = vrot.slane %v299_v35, %v554_v38  ;;  %v1762_v54 = vrot.slane %v299_v35, %v558_v40 }
  0xb0   : > { %460 = vmatpush1.bf16.msra.mxu0 %v421_v7  ;;  %1314 = vmatmul.mubr.msk.bf16.vlgmr.msra.gmra.mxu1 %vm431_vm13, %v430_v26 }
  0xb1   : > { %1327 = vmatprep.mubr.msk.bf16.mxu1 %vm1591_vm2, %v1582_v0 }
  0xb3   : > { %1275 = vmatmul.mubr.msk.bf16.vlgmr.msra.gmra.mxu0 %vm431_vm13, %v430_v26  ;;  %vm1078_vm13 = vcmask 1045504  }
  0xb4   : > { %741 = vmatprep.mubr.bf16.mxu0 %v1590_v13 }
  0xb8   : > { %v530_v28 = vpop.permute.xlu0 %529  ;;  %v539_v34 = vpop.permute.xlu1 %538 }
 0x170   : > { %v520_v29 = vpop.f32.mrf.mxu1 }
 0x171   : > { %v534_v30 = vmul.f32 %v530_v28, %v520_v29 }
 0x172   : > { %v1315_v31 = vpop.f32.mrf.mxu1 }
 0x173   : > { %v479_v33 = vpop.f32.mrf.mxu0  ;;  %v543_v42 = vadd.f32 %v539_v34, %v534_v30 }
 0x174   : > { %v532_v36 = vmul.f32 %v530_v28, %v479_v33  ;;  %v523_v37 = vpop.f32.mrf.mxu1 }
 0x175   : > { %v481_v39 = vpop.f32.mrf.mxu0  ;;  %v546_v51 = vmax.f32 %v543_v42, 0.0 }
 0x176   : > { %v541_v41 = vadd.f32 %v539_v34, %v532_v36  ;;  %v533_v43 = vmul.f32 %v530_v28, %v481_v39  ;;  %v1316_v45 = vpop.f32.mrf.mxu1 }
 0x177   : > { %v483_v46 = vpop.f32.mrf.mxu0  ;;  %v565_v56 = vmul.f32 %v1762_v54, %v546_v51 }
 0x178   : > { %v544_v47 = vmax.f32 %v541_v41, 0.0  ;;  %v542_v48 = vadd.f32 %v539_v34, %v533_v43 }
 0x179   : > { %v484_v50 = vpop.f32.mrf.mxu0 }
 0x17a   : > { %v545_v52 = vmax.f32 %v542_v48, 0.0  ;;  %v563_v53 = vmul.f32 %v1757_v44, %v544_v47 }
 0x17c   : > { %569 = vrot.lane.b32.xlu1 %v563_v53, %s1593_s28  ;;  %v564_v55 = vmul.f32 %v1759_v49, %v545_v52 }
 0x17e   : > { %571 = vrot.lane.b32.xlu0 %v564_v55, %s1593_s28 }
 0x180   : > { %573 = vrot.lane.b32.xlu1 %v565_v56, %s1593_s28 }
 0x1ee   : > { %v570_v57 = vpop.permute.xlu1 %569 }
 0x1ef   : > { %582 = vst.msk [vmem:[%s1649_s10 + $0x18] sm:$0xf] %vm581_vm14, %v570_v57 }
 0x1f0   : > { %v572_v58 = vpop.permute.xlu0 %571 }
 0x1f1   : > { %v576_v59 = vsel %vm575_vm15, %v570_v57, %v572_v58 }
 0x1f2   : > { %583 = vst [vmem:[%s1649_s10 + $0x20] sm:$0xf] %v576_v59  ;;  %v574_v60 = vpop.permute.xlu1 %573 }
 0x1f3   : > { %v577_v61 = vsel %vm575_vm15, %v572_v58, %v574_v60 }
 0x1f4   : > { %585 = vst.msk [vmem:[%s1649_s10 + $0x28] sm:$0xf] %vm584_vm0, %v577_v61 }
 0x1f6   : > { %v1777_v62 = vld [vmem:[%s1649_s10 + $0x18] sm:$0xff] }
 0x1f7   : > { %658 = vrot.lane.b32.xlu1 %v1777_v62, %s1585_s13  ;;  %647 = vrot.lane.b32.xlu0 %v1777_v62, %s1587_s15 }
 0x1f9   : > { %v1791_v1 = vld [vmem:[%s1649_s10 + $0x20] sm:$0xff] }
 0x1fa   : > { %v1413_v3 = vpack.i.bf16 %v1791_v1, %v1777_v62 }
 0x1fb   : > { %636 = vrot.lane.b32.xlu1 %v1777_v62, %s1584_s12  ;;  %625 = vrot.lane.b32.xlu0 %v1777_v62, %s1588_s16  ;;  %v1788_v63 = vld [vmem:[%s1649_s10 + $0x28] sm:$0xff] }
 0x1fc   : > { %v1799_v2 = vpack.i.bf16 %v1788_v63, %v1791_v1 }
 0x1ff   : > { %603 = vrot.lane.b32.xlu0 %v1777_v62, %s1589_s17  ;;  %673 = vrot.lane.b32.xlu1 %v1788_v63, %s1586_s14 }
 0x203   : > { %1424 = vrot.lane.b32.xlu1 %v1799_v2, %s1585_s13  ;;  %1414 = vrot.lane.b32.xlu0 %v1413_v3, %s1586_s14 }
 0x207   : > { %1434 = vrot.lane.b32.xlu1 %v1799_v2, %s1584_s12  ;;  %1419 = vrot.lane.b32.xlu0 %v1799_v2, %s1587_s15 }
 0x20b   : > { %1444 = vrot.lane.b32.xlu1 %v1799_v2, %s1592_s18  ;;  %1429 = vrot.lane.b32.xlu0 %v1799_v2, %s1588_s16 }
 0x20f   : > { %614 = vrot.lane.b32.xlu1 %v1777_v62, %s1592_s18  ;;  %1439 = vrot.lane.b32.xlu0 %v1799_v2, %s1589_s17 }
 0x213   : > { %592 = vrot.lane.b32.xlu1 %v1777_v62, %s1583_s11  ;;  %1449 = vrot.lane.b32.xlu0 %v1799_v2, %s1583_s11 }
 0x217   : > { %804 = vperm.xlu1 %1412, %v1281_v4   ;;  %794 = vperm.xlu0 %1411, %v1280_v5  }
 0x269   : > { %v659_v6 = vpop.permute.xlu1 %658  ;;  %v648_v8 = vpop.permute.xlu0 %647 }
 0x26d   : > { %v637_v10 = vpop.permute.xlu1 %636  ;;  %v626_v12 = vpop.permute.xlu0 %625 }
 0x271   : > { %v674_v14 = vpop.permute.xlu1 %673  ;;  %v604_v15 = vpop.permute.xlu0 %603 }
 0x272   : > { %v694_v16 = vpack.c.bf16 %v674_v14, %v674_v14 }
 0x274   : > { %v707_v17 = vsel %vm408_vm9, %v694_v16, 0 }
 0x275   : > { %1318 = vmatpush3.bf16.msra.mxu1 %v707_v17  ;;  %v1425_v18 = vpop.permute.xlu1 %1424  ;;  %v1415_v19 = vpop.permute.xlu0 %1414 }
 0x276   : > { %v1417_v20 = vunpack.i.h.bf16 %v1415_v19  ;;  %v1416_v21 = vunpack.i.l.bf16 %v1415_v19  ;;  %1319 = vmatprep.subr.bf16.mxu1 %v1582_v0  ;;  %v1427_v22 = vunpack.i.h.bf16 %v1425_v18  ;;  %v1426_v11 = vunpack.i.l.bf16 %v1425_v18 }
 0x278   : > { %v676_v23 = vsel %vm402_vm3, %v1417_v20, %v674_v14  ;;  %v675_v24 = vsel %vm402_vm3, %v1416_v21, %v1417_v20  ;;  %v664_v29 = vsel %vm390_vm7, %v659_v6, %v1426_v11  ;;  %v665_v32 = vsel %vm390_vm7, %v1426_v11, %v1427_v22  ;;  %v695_v20 = vld [vmem:[%s2061_s3] sm:$0x3] }
 0x279   : > { %v693_v25 = vpack.c.bf16 %v676_v23, %v676_v23  ;;  %v1435_v26 = vpop.permute.xlu1 %1434  ;;  %v1420_v7 = vpop.permute.xlu0 %1419  ;;  %v692_v9 = vpack.c.bf16 %v675_v24, %v675_v24 }
 0x27a   : > { %v1422_v27 = vunpack.i.h.bf16 %v1420_v7  ;;  %v1421_v28 = vunpack.i.l.bf16 %v1420_v7  ;;  %v1436_v30 = vunpack.i.l.bf16 %v1435_v26  ;;  %v1437_v33 = vunpack.i.h.bf16 %v1435_v26 }
 0x27b   : > { %1277 = vmatprep.subr.msk.bf16.mxu0 %vm408_vm9, %v693_v25  ;;  %v701_v31 = vsel %vm408_vm9, %v692_v9, 0 }
 0x27c   : > { %v691_v34 = vpack.c.bf16 %v1427_v22, %v1422_v27  ;;  %v653_v35 = vsel %vm378_vm5, %v648_v8, %v1421_v28  ;;  %716 = vmatpush1.bf16.msra.mxu0 %v701_v31  ;;  %v654_v36 = vsel %vm378_vm5, %v1421_v28, %v1422_v27  ;;  %v642_v43 = vsel %vm366_vm6, %v637_v10, %v1436_v30 }
 0x27d   : > { %v689_v37 = vpack.c.bf16 %v664_v29, %v653_v35  ;;  %v1445_v38 = vpop.permute.xlu1 %1444  ;;  %v1430_v39 = vpop.permute.xlu0 %1429  ;;  %v690_v40 = vpack.c.bf16 %v665_v32, %v654_v36  ;;  %v643_v51 = vsel %vm366_vm6, %v1436_v30, %v1437_v33 }
 0x27e   : > { %v1432_v41 = vunpack.i.h.bf16 %v1430_v39  ;;  %v1431_v42 = vunpack.i.l.bf16 %v1430_v39  ;;  %1320 = vmatpush3.bf16.msra.mxu1 %v691_v34  ;;  %v1447_v45 = vunpack.i.h.bf16 %v1445_v38  ;;  %v1446_v46 = vunpack.i.l.bf16 %v1445_v38 }
 0x27f   : > { %717 = vmatprep.subr.bf16.mxu0 %v690_v40  ;;  %1321 = vmatprep.subr.bf16.mxu1 %v1582_v0 }
 0x280   : > { %v688_v47 = vpack.c.bf16 %v1437_v33, %v1432_v41  ;;  %v631_v48 = vsel %vm354_vm8, %v626_v12, %v1431_v42  ;;  %718 = vmatpush1.bf16.msra.mxu0 %v689_v37  ;;  %v632_v50 = vsel %vm354_vm8, %v1431_v42, %v1432_v41  ;;  %v621_v59 = vsel %vm342_vm12, %v1446_v46, %v1447_v45 }
 0x281   : > { %v686_v52 = vpack.c.bf16 %v642_v43, %v631_v48  ;;  %v615_v53 = vpop.permute.xlu1 %614  ;;  %v1440_v55 = vpop.permute.xlu0 %1439  ;;  %v687_v56 = vpack.c.bf16 %v643_v51, %v632_v50  ;;  %v1866_v41 = vrot.slane %v1788_v63, 4  ;;  %v1870_v43 = vrot.slane %v1791_v1, 4 }
 0x282   : > { %v1442_v57 = vunpack.i.h.bf16 %v1440_v55  ;;  %v1441_v58 = vunpack.i.l.bf16 %v1440_v55  ;;  %1322 = vmatpush3.bf16.msra.mxu1 %v688_v47  ;;  %v620_v60 = vsel %vm342_vm12, %v615_v53, %v1446_v46  ;;  %v1463_v46 = vpack.i.bf16 %v1777_v62, %v1788_v63 }
 0x283   : > { %719 = vmatprep.subr.bf16.mxu0 %v687_v56  ;;  %1323 = vmatprep.subr.bf16.mxu1 %v1582_v0 }
 0x284   : > { %v685_v61 = vpack.c.bf16 %v1447_v45, %v1442_v57  ;;  %v609_v3 = vsel %vm330_vm11, %v604_v15, %v1441_v58  ;;  %720 = vmatpush1.bf16.msra.mxu0 %v686_v52  ;;  %v610_v4 = vsel %vm330_vm11, %v1441_v58, %v1442_v57  ;;  %v1453_v45 = vpack.i.bf16 %v1866_v41, %v1870_v43 }
 0x285   : > { %v683_v5 = vpack.c.bf16 %v620_v60, %v609_v3  ;;  %v1450_v6 = vpop.permute.xlu0 %1449  ;;  %v684_v8 = vpack.c.bf16 %v621_v59, %v610_v4  ;;  %v593_v14 = vpop.permute.xlu1 %592  ;;  %v1896_v60 = vrot.slane %v1777_v62, 4 }
 0x286   : > { %v1452_v10 = vunpack.i.h.bf16 %v1450_v6  ;;  %v1451_v12 = vunpack.i.l.bf16 %v1450_v6  ;;  %1324 = vmatpush3.bf16.msra.mxu1 %v685_v61 }
 0x287   : > { %721 = vmatprep.subr.bf16.mxu0 %v684_v8  ;;  %1325 = vmatprep.subr.bf16.mxu1 %v1582_v0 }
 0x288   : > { %v682_v16 = vpack.c.bf16 %v1452_v10, %v1788_v63  ;;  %v598_v17 = vsel %vm318_vm10, %v593_v14, %v1451_v12  ;;  %722 = vmatpush1.bf16.msra.mxu0 %v683_v5  ;;  %v599_v15 = vsel %vm318_vm10, %v1451_v12, %v1452_v10 }
 0x289   : > { %v680_v18 = vpack.c.bf16 %v598_v17, %v1777_v62  ;;  %v681_v19 = vpack.c.bf16 %v599_v15, %v1791_v1  ;;  %v1286_v17 = vld [vmem:[%s2064_s6 + $0x8] sm:$0xf] }
 0x28a   : > { %1326 = vmatpush3.bf16.msra.mxu1 %v682_v16  ;;  %v1285_v15 = vld [vmem:[%s2063_s5 + $0x8] sm:$0xf] }
 0x28b   : > { %723 = vmatprep.subr.bf16.mxu0 %v681_v19  ;;  %1331 = vmatprep.subr.bf16.mxu1 %v1582_v0 }
 0x28c   : > { %724 = vmatpush1.bf16.msra.mxu0 %v680_v18 }
 0x28d   : > { %1328 = vmatmul.mubr.msk.bf16.vlgmr.msra.gmra.mxu1 %vm696_vm1, %v695_v20 }
 0x28e   : > { %1345 = vmatprep.mubr.msk.bf16.mxu1 %vm1591_vm2, %v1582_v0  ;;  %vm833_vm2 = vcmask 1047708  }
 0x28f   : > { %1278 = vmatmul.mubr.msk.bf16.vlgmr.msra.gmra.mxu0 %vm696_vm1, %v695_v20 }
 0x290   : > { %1120 = vmatprep.mubr.bf16.mxu0 %v1590_v13 }
 0x292   : > { %v795_v21 = vpop.permute.xlu0 %794  ;;  %v805_v11 = vpop.permute.xlu1 %804 }
 0x34d   : > { %v784_v22 = vpop.f32.mrf.mxu1 }
 0x34e   : > { %v799_v23 = vmul.f32 %v795_v21, %v784_v22 }
 0x34f   : > { %v743_v24 = vpop.f32.mrf.mxu0  ;;  %v1329_v25 = vpop.f32.mrf.mxu1 }
 0x350   : > { %v809_v26 = vadd.f32 %v805_v11, %v799_v23  ;;  %v797_v7 = vmul.f32 %v795_v21, %v743_v24 }
 0x351   : > { %v745_v9 = vpop.f32.mrf.mxu0  ;;  %v787_v27 = vpop.f32.mrf.mxu1 }
 0x352   : > { %v807_v28 = vadd.f32 %v805_v11, %v797_v7  ;;  %v798_v29 = vmul.f32 %v795_v21, %v745_v9  ;;  %v812_v32 = vmax.f32 %v809_v26, 0.0 }
 0x353   : > { %v747_v30 = vpop.f32.mrf.mxu0  ;;  %v1330_v31 = vpop.f32.mrf.mxu1 }
 0x354   : > { %v810_v33 = vmax.f32 %v807_v28, 0.0  ;;  %v808_v34 = vadd.f32 %v805_v11, %v798_v29  ;;  %v815_v39 = vmul.f32 %v812_v32, %v1762_v54 }
 0x355   : > { %v748_v35 = vpop.f32.mrf.mxu0 }
 0x356   : > { %v811_v36 = vmax.f32 %v808_v34, 0.0  ;;  %v813_v13 = vmul.f32 %v810_v33, %v1757_v44  ;;  %v821_v42 = vrot.slane %v815_v39, 4 }
 0x358   : > { %v819_v37 = vrot.slane %v813_v13, 4  ;;  %v814_v38 = vmul.f32 %v811_v36, %v1759_v49 }
 0x35a   : > { %822 = vrot.lane.b32.xlu0 %v819_v37, %s1593_s28  ;;  %v820_v40 = vrot.slane %v814_v38, 4 }
 0x35c   : > { %824 = vrot.lane.b32.xlu1 %v820_v40, %s1593_s28 }
 0x35e   : > { %826 = vrot.lane.b32.xlu0 %v821_v42, %s1593_s28 }
 0x360   : > { %1454 = vrot.lane.b32.xlu1 %v1453_v45, %s1586_s14 }
 0x362   : > { %1459 = vrot.lane.b32.xlu0 %v1453_v45, %s1587_s15 }
 0x364   : > { %1469 = vrot.lane.b32.xlu1 %v1799_v2, %s1584_s12 }
 0x366   : > { %1464 = vrot.lane.b32.xlu0 %v1463_v46, %s1585_s13 }
 0x36a   : > { %1474 = vrot.lane.b32.xlu0 %v1453_v45, %s1588_s16 }
 0x36e   : > { %1509 = vrot.lane.b32.xlu0 %v1453_v45, %s1589_s17 }
 0x372   : > { %1524 = vrot.lane.b32.xlu0 %v1463_v46, %s1592_s18 }
 0x3cc   : > { %v823_v47 = vpop.permute.xlu0 %822 }
 0x3cd   : > { %834 = vst.msk [vmem:[%s1649_s10] sm:$0xf0] %vm833_vm2, %v823_v47 }
 0x3ce   : > { %v825_v48 = vpop.permute.xlu1 %824 }
 0x3cf   : > { %v828_v50 = vsel %vm575_vm15, %v823_v47, %v825_v48 }
 0x3d0   : > { %835 = vst [vmem:[%s1649_s10 + $0x8] sm:$0xf0] %v828_v50  ;;  %v827_v51 = vpop.permute.xlu0 %826 }
 0x3d1   : > { %v829_v63 = vsel %vm575_vm15, %v825_v48, %v827_v51 }
 0x3d2   : > { %837 = vst.msk [vmem:[%s1649_s10 + $0x10] sm:$0xf0] %vm836_vm4, %v829_v63  ;;  %v1455_v20 = vpop.permute.xlu1 %1454 }
 0x3d3   : > { %v1457_v25 = vunpack.i.h.bf16 %v1455_v20  ;;  %v1456_v26 = vunpack.i.l.bf16 %v1455_v20 }
 0x3d4   : > { %v838_v52 = vld [vmem:[%s1649_s10] sm:$0xf0]  ;;  %v1460_v18 = vpop.permute.xlu0 %1459 }
 0x3d5   : > { %v1478_v53 = vpack.i.bf16 %v1791_v1, %v838_v52  ;;  %v850_v1 = vrot.slane %v838_v52, 4  ;;  %v1462_v7 = vunpack.i.h.bf16 %v1460_v18  ;;  %v1461_v9 = vunpack.i.l.bf16 %v1460_v18 }
 0x3d6   : > { %v1950_v22 = vpop.permute.xlu1 %1469  ;;  %v1034_v34 = vsel %vm402_vm3, %v1456_v26, %v1457_v25 }
 0x3d7   : > { %1479 = vrot.lane.b32.xlu1 %v1478_v53, %s1585_s13  ;;  %v839_v55 = vld [vmem:[%s1649_s10 + $0x8] sm:$0xf0]  ;;  %v1916_v8 = vsel %vm408_vm9, %v850_v1, %v1896_v60  ;;  %v1472_v32 = vunpack.i.h.bf16 %v1950_v22  ;;  %v1471_v33 = vunpack.i.l.bf16 %v1950_v22  ;;  %v990_v36 = vsel %vm378_vm5, %v1461_v9, %v1462_v7 }
 0x3d8   : > { %v853_v59 = vrot.slane %v839_v55, 4  ;;  %v1488_v4 = vpack.i.bf16 %v839_v55, %v1777_v62  ;;  %v1503_v16 = vpack.i.bf16 %v1916_v8, %v1896_v60  ;;  %v1946_v19 = vpop.permute.xlu0 %1464 }
 0x3d9   : > { %v840_v56 = vld [vmem:[%s1649_s10 + $0x10] sm:$0xf0]  ;;  %v1466_v40 = vunpack.i.l.bf16 %v1946_v19  ;;  %v1467_v48 = vunpack.i.h.bf16 %v1946_v19  ;;  %v968_v63 = vsel %vm366_vm6, %v1471_v33, %v1472_v32 }
 0x3da   : > { %v1483_v57 = vpack.i.bf16 %v840_v56, %v839_v55  ;;  %v856_v58 = vrot.slane %v840_v56, 4  ;;  %v1908_v5 = vsel %vm408_vm9, %v853_v59, %v1870_v43  ;;  %v1498_v12 = vpack.i.bf16 %v838_v52, %v840_v56 }
 0x3db   : > { %v1543_v6 = vpack.i.bf16 %v1908_v5, %v1896_v60  ;;  %v1493_v10 = vpack.i.bf16 %v1908_v5, %v1916_v8 }
 0x3dc   : > { %1484 = vrot.lane.b32.xlu1 %v1483_v57, %s1585_s13  ;;  %v1901_v61 = vsel %vm408_vm9, %v856_v58, %v1866_v41  ;;  %v1948_v21 = vpop.permute.xlu0 %1474 }
 0x3dd   : > { %v1538_v3 = vpack.i.bf16 %v1896_v60, %v1901_v61  ;;  %v1548_v62 = vpack.i.bf16 %v1916_v8, %v1901_v61  ;;  %v1553_v14 = vpack.i.bf16 %v1901_v61, %v1908_v5  ;;  %v1477_v52 = vunpack.i.h.bf16 %v1948_v21 }
 0x3df   : > { %1539 = vrot.lane.b32.xlu0 %v1538_v3, %s1586_s14 }
 0x3e0   : > { %1489 = vrot.lane.b32.xlu1 %v1488_v4, %s1584_s12 }
 0x3e3   : > { %1544 = vrot.lane.b32.xlu0 %v1543_v6, %s1587_s15 }
 0x3e4   : > { %1494 = vrot.lane.b32.xlu1 %v1493_v10, %s1586_s14 }
 0x3e7   : > { %1549 = vrot.lane.b32.xlu0 %v1548_v62, %s1587_s15 }
 0x3e8   : > { %1499 = vrot.lane.b32.xlu1 %v1498_v12, %s1584_s12 }
 0x3eb   : > { %1554 = vrot.lane.b32.xlu0 %v1553_v14, %s1588_s16 }
 0x3ec   : > { %1504 = vrot.lane.b32.xlu1 %v1503_v16, %s1588_s16 }
 0x3ef   : > { %1559 = vrot.lane.b32.xlu0 %v1543_v6, %s1589_s17 }
 0x3f0   : > { %1514 = vrot.lane.b32.xlu1 %v1483_v57, %s1592_s18 }
 0x3f3   : > { %1564 = vrot.lane.b32.xlu0 %v1548_v62, %s1589_s17 }
 0x3f4   : > { %1519 = vrot.lane.b32.xlu1 %v1478_v53, %s1592_s18 }
 0x3f7   : > { %1569 = vrot.lane.b32.xlu0 %v1498_v12, %s1583_s11 }
 0x3f8   : > { %1529 = vrot.lane.b32.xlu1 %v1799_v2, %s1583_s11  ;;  %v1952_v2 = vpop.permute.xlu0 %1509 }
 0x3fb   : > { %1183 = vperm.xlu0 %1411, %v1286_v17  }
 0x3fc   : > { %1534 = vrot.lane.b32.xlu1 %v1488_v4, %s1583_s11  ;;  %v1954_v23 = vpop.permute.xlu0 %1524 }
 0x400   : > { %1173 = vperm.xlu1 %1412, %v1285_v15  }
 0x449   : > { %v1480_v11 = vpop.permute.xlu1 %1479 }
 0x44a   : > { %v1482_v42 = vunpack.i.h.bf16 %v1480_v11  ;;  %v1481_v53 = vunpack.i.l.bf16 %v1480_v11 }
 0x44c   : > { %v1012_v12 = vsel %vm390_vm7, %v1482_v42, %v1466_v40 }
 0x44e   : > { %v1485_v24 = vpop.permute.xlu1 %1484 }
 0x44f   : > { %v1487_v27 = vunpack.i.h.bf16 %v1485_v24  ;;  %v1486_v28 = vunpack.i.l.bf16 %v1485_v24  ;;  %v1476_v24 = vunpack.i.l.bf16 %v1948_v21 }
 0x451   : > { %v1540_v29 = vpop.permute.xlu0 %1539  ;;  %v1052_v13 = vsel %vm408_vm9, %v1462_v7, %v1487_v27  ;;  %v1010_v37 = vsel %vm390_vm7, %v1486_v28, %v1487_v27  ;;  %v1009_v14 = vsel %vm390_vm7, %v1481_v53, %v1486_v28 }
 0x452   : > { %v1541_v30 = vunpack.i.l.bf16 %v1540_v29  ;;  %v1956_v31 = vpop.permute.xlu1 %1489  ;;  %v1542_v38 = vunpack.i.h.bf16 %v1540_v29  ;;  %v1070_v55 = vpack.c.bf16 %v1466_v40, %v1052_v13  ;;  %v1051_v56 = vsel %vm408_vm9, %v990_v36, %v1010_v37 }
 0x453   : > { %v1069_v20 = vpack.c.bf16 %v1012_v12, %v1051_v56  ;;  %v1492_v27 = vunpack.i.h.bf16 %v1956_v31 }
 0x454   : > { %v1073_v35 = vpack.c.bf16 %v1457_v25, %v1541_v30  ;;  %v1033_v57 = vsel %vm402_vm3, %v1542_v38, %v1456_v26  ;;  %v1011_v25 = vsel %vm390_vm7, %v1467_v48, %v1482_v42  ;;  %v1491_v26 = vunpack.i.l.bf16 %v1956_v31 }
 0x455   : > { %v1545_v39 = vpop.permute.xlu0 %1544  ;;  %v946_v31 = vsel %vm354_vm8, %v1476_v24, %v1477_v52  ;;  %v1511_v48 = vunpack.i.l.bf16 %v1952_v2 }
 0x456   : > { %v1546_v45 = vunpack.i.l.bf16 %v1545_v39  ;;  %v1495_v46 = vpop.permute.xlu1 %1494  ;;  %v1086_v47 = vsel %vm1078_vm13, %v1073_v35, 0  ;;  %v1547_v16 = vunpack.i.h.bf16 %v1545_v39  ;;  %v967_v40 = vsel %vm366_vm6, %v1491_v26, %v1471_v33 }
 0x457   : > { %v1497_v50 = vunpack.i.h.bf16 %v1495_v46  ;;  %v1496_v51 = vunpack.i.l.bf16 %v1495_v46  ;;  %1332 = vmatpush3.bf16.msra.mxu1 %v1086_v47  ;;  %v1512_v47 = vunpack.i.h.bf16 %v1952_v2 }
 0x458   : > { %1333 = vmatprep.subr.bf16.mxu1 %v1582_v0  ;;  %v989_v58 = vsel %vm378_vm5, %v1546_v45, %v1461_v9 }
 0x459   : > { %v1032_v59 = vsel %vm402_vm3, %v1497_v50, %v1541_v30  ;;  %v1031_v3 = vsel %vm402_vm3, %v1496_v51, %v1497_v50  ;;  %v1550_v1 = vpop.permute.xlu0 %1549  ;;  %v1050_v11 = vsel %vm408_vm9, %v989_v58, %v1009_v14  ;;  %v1526_v50 = vunpack.i.l.bf16 %v1954_v23 }
 0x45a   : > { %v1072_v4 = vpack.c.bf16 %v1034_v34, %v1032_v59  ;;  %v1551_v6 = vunpack.i.l.bf16 %v1550_v1  ;;  %v1500_v10 = vpop.permute.xlu1 %1499  ;;  %v1071_v62 = vpack.c.bf16 %v1033_v57, %v1031_v3  ;;  %v1552_v17 = vunpack.i.h.bf16 %v1550_v1 }
 0x45b   : > { %v1501_v15 = vunpack.i.l.bf16 %v1500_v10  ;;  %1334 = vmatpush3.bf16.msra.mxu1 %v1070_v55  ;;  %v1502_v28 = vunpack.i.h.bf16 %v1500_v10  ;;  %v1068_v36 = vpack.c.bf16 %v1011_v25, %v1050_v11  ;;  %v902_v1 = vsel %vm330_vm11, %v1511_v48, %v1512_v47 }
 0x45c   : > { %v1067_v18 = vpack.c.bf16 %v1551_v6, %v1472_v32  ;;  %1282 = vmatprep.subr.msk.bf16.mxu0 %vm1078_vm13, %v1072_v4  ;;  %v1080_v19 = vsel %vm1078_vm13, %v1071_v62, 0  ;;  %1335 = vmatprep.subr.bf16.mxu1 %v1582_v0  ;;  %v988_v9 = vsel %vm378_vm5, %v1547_v16, %v1551_v6  ;;  %v987_v34 = vsel %vm378_vm5, %v1552_v17, %v1547_v16 }
 0x45d   : > { %v1555_v7 = vpop.permute.xlu0 %1554  ;;  %1091 = vmatpush1.bf16.msra.mxu0 %v1080_v19  ;;  %v1049_v35 = vsel %vm408_vm9, %v1477_v52, %v1501_v15  ;;  %v966_v13 = vsel %vm366_vm6, %v1492_v27, %v1501_v15  ;;  %v1066_v39 = vpack.c.bf16 %v988_v9, %v968_v63  ;;  %v1065_v51 = vpack.c.bf16 %v987_v34, %v967_v40 }
 0x45e   : > { %v1557_v29 = vunpack.i.h.bf16 %v1555_v7  ;;  %v1556_v30 = vunpack.i.l.bf16 %v1555_v7  ;;  %v1505_v32 = vpop.permute.xlu1 %1504  ;;  %1092 = vmatprep.subr.bf16.mxu0 %v1069_v20  ;;  %v965_v22 = vsel %vm366_vm6, %v1502_v28, %v1492_v27  ;;  %v1048_v53 = vsel %vm408_vm9, %v946_v31, %v966_v13 }
 0x45f   : > { %v1506_v21 = vunpack.i.l.bf16 %v1505_v32  ;;  %1336 = vmatpush3.bf16.msra.mxu1 %v1067_v18  ;;  %v1507_v38 = vunpack.i.h.bf16 %v1505_v32  ;;  %v1527_v10 = vunpack.i.h.bf16 %v1954_v23 }
 0x460   : > { %v1064_v37 = vpack.c.bf16 %v1049_v35, %v1557_v29  ;;  %1337 = vmatprep.subr.bf16.mxu1 %v1582_v0  ;;  %v944_v46 = vsel %vm354_vm8, %v1556_v30, %v1557_v29 }
 0x461   : > { %v945_v42 = vsel %vm354_vm8, %v1506_v21, %v1476_v24  ;;  %v1997_v45 = vpop.permute.xlu0 %1559  ;;  %1093 = vmatpush1.bf16.msra.mxu0 %v1068_v36  ;;  %v943_v55 = vsel %vm354_vm8, %v1507_v38, %v1556_v30  ;;  %v1063_v58 = vpack.c.bf16 %v1048_v53, %v944_v46 }
 0x462   : > { %v1515_v63 = vpop.permute.xlu1 %1514  ;;  %1094 = vmatprep.subr.bf16.mxu0 %v1066_v39  ;;  %v1047_v56 = vsel %vm408_vm9, %v945_v42, %v965_v22  ;;  %v1561_v57 = vunpack.i.l.bf16 %v1997_v45  ;;  %v1562_v7 = vunpack.i.h.bf16 %v1997_v45 }
 0x463   : > { %v1517_v52 = vunpack.i.h.bf16 %v1515_v63  ;;  %v1516_v33 = vunpack.i.l.bf16 %v1515_v63  ;;  %1338 = vmatpush3.bf16.msra.mxu1 %v1064_v37  ;;  %v1062_v62 = vpack.c.bf16 %v1047_v56, %v943_v55 }
 0x464   : > { %1339 = vmatprep.subr.bf16.mxu1 %v1582_v0  ;;  %v901_v16 = vsel %vm330_vm11, %v1561_v57, %v1511_v48  ;;  %v1074_v48 = vld [vmem:[%s2062_s4] sm:$0x3] }
 0x465   : > { %v1046_v2 = vsel %vm408_vm9, %v1512_v47, %v1517_v52  ;;  %v922_v59 = vsel %vm342_vm12, %v1516_v33, %v1517_v52  ;;  %v1565_v3 = vpop.permute.xlu0 %1564  ;;  %1095 = vmatpush1.bf16.msra.mxu0 %v1065_v51 }
 0x466   : > { %v1061_v4 = vpack.c.bf16 %v1526_v50, %v1046_v2  ;;  %v1520_v6 = vpop.permute.xlu1 %1519  ;;  %1096 = vmatprep.subr.bf16.mxu0 %v1063_v58  ;;  %v1045_v17 = vsel %vm408_vm9, %v902_v1, %v922_v59  ;;  %v1566_v15 = vunpack.i.l.bf16 %v1565_v3  ;;  %v1567_v29 = vunpack.i.h.bf16 %v1565_v3 }
 0x467   : > { %v1522_v12 = vunpack.i.h.bf16 %v1520_v6  ;;  %v1521_v14 = vunpack.i.l.bf16 %v1520_v6 }
 0x468   : > { %1340 = vmatpush3.bf16.msra.mxu1 %v1061_v4  ;;  %v900_v34 = vsel %vm330_vm11, %v1562_v7, %v1566_v15  ;;  %v899_v39 = vsel %vm330_vm11, %v1567_v29, %v1562_v7 }
 0x469   : > { %v923_v18 = vsel %vm342_vm12, %v1527_v10, %v1522_v12  ;;  %v921_v19 = vsel %vm342_vm12, %v1521_v14, %v1516_v33  ;;  %v1570_v20 = vpop.permute.xlu0 %1569  ;;  %1097 = vmatpush1.bf16.msra.mxu0 %v1062_v62  ;;  %v924_v11 = vsel %vm342_vm12, %v1522_v12, %v1526_v50  ;;  %1341 = vmatprep.subr.bf16.mxu1 %v1582_v0 }
 0x46a   : > { %v1044_v23 = vsel %vm408_vm9, %v901_v16, %v921_v19  ;;  %v1571_v24 = vunpack.i.l.bf16 %v1570_v20  ;;  %v1530_v25 = vpop.permute.xlu1 %1529  ;;  %v1060_v26 = vpack.c.bf16 %v924_v11, %v1045_v17  ;;  %v1572_v13 = vunpack.i.h.bf16 %v1570_v20 }
 0x46b   : > { %v1059_v9 = vpack.c.bf16 %v923_v18, %v1044_v23  ;;  %v1532_v27 = vunpack.i.h.bf16 %v1530_v25  ;;  %v1531_v28 = vunpack.i.l.bf16 %v1530_v25 }
 0x46c   : > { %1098 = vmatprep.subr.bf16.mxu0 %v1060_v26  ;;  %v1043_v35 = vsel %vm408_vm9, %v1866_v41, %v1571_v24 }
 0x46d   : > { %v1058_v30 = vpack.c.bf16 %v1566_v15, %v1532_v27  ;;  %1099 = vmatpush1.bf16.msra.mxu0 %v1059_v9  ;;  %v880_v32 = vsel %vm318_vm10, %v1531_v28, %v1532_v27  ;;  %v1055_v31 = vpack.c.bf16 %v1043_v35, %v1901_v61 }
 0x46e   : > { %v1535_v21 = vpop.permute.xlu1 %1534  ;;  %v1057_v36 = vpack.c.bf16 %v900_v34, %v880_v32 }
 0x46f   : > { %v1537_v37 = vunpack.i.h.bf16 %v1535_v21  ;;  %v1536_v38 = vunpack.i.l.bf16 %v1535_v21  ;;  %1342 = vmatpush3.bf16.msra.mxu1 %v1058_v30 }
 0x470   : > { %1100 = vmatprep.subr.bf16.mxu0 %v1057_v36  ;;  %1343 = vmatprep.subr.bf16.mxu1 %v1582_v0 }
 0x471   : > { %v877_v40 = vsel %vm318_vm10, %v1572_v13, %v1537_v37  ;;  %v878_v42 = vsel %vm318_vm10, %v1537_v37, %v1571_v24  ;;  %v879_v45 = vsel %vm318_vm10, %v1536_v38, %v1531_v28 }
 0x472   : > { %v1056_v41 = vpack.c.bf16 %v899_v39, %v879_v45  ;;  %v1042_v46 = vsel %vm408_vm9, %v1870_v43, %v878_v42  ;;  %v1041_v0 = vsel %vm408_vm9, %v1896_v60, %v877_v40 }
 0x473   : > { %1344 = vmatpush3.bf16.msra.mxu1 %v1055_v31  ;;  %v1054_v47 = vpack.c.bf16 %v1042_v46, %v1908_v5  ;;  %v1053_v61 = vpack.c.bf16 %v1041_v0, %v1916_v8 }
 0x474   : > { %1101 = vmatpush1.bf16.msra.mxu0 %v1056_v41 }
 0x475   : > { %1102 = vmatprep.subr.bf16.mxu0 %v1054_v47 }
 0x476   : > { %1346 = vmatmul.mubr.msk.bf16.vlgmr.msra.gmra.mxu1 %vm366_vm6, %v1074_v48  ;;  %v1184_v53 = vpop.permute.xlu0 %1183 }
 0x478   : > { %1103 = vmatpush1.bf16.msra.mxu0 %v1053_v61 }
 0x47b   : > { %1283 = vmatmul.mubr.msk.bf16.vlgmr.msra.gmra.mxu0 %vm366_vm6, %v1074_v48  ;;  %v1174_v51 = vpop.permute.xlu1 %1173 }
 0x536   : > { %v1163_v43 = vpop.f32.mrf.mxu1 }
 0x537   : > { %v1178_v5 = vmul.f32 %v1174_v51, %v1163_v43 }
 0x538   : > { %v1347_v50 = vpop.f32.mrf.mxu1 }
 0x539   : > { %v1188_v60 = vadd.f32 %v1184_v53, %v1178_v5 }
 0x53a   : > { %v1166_v63 = vpop.f32.mrf.mxu1 }
 0x53b   : > { %v1122_v22 = vpop.f32.mrf.mxu0  ;;  %v1191_v3 = vmax.f32 %v1188_v60, 0.0 }
 0x53c   : > { %v1176_v52 = vmul.f32 %v1174_v51, %v1122_v22  ;;  %v1348_v33 = vpop.f32.mrf.mxu1 }
 0x53d   : > { %v1124_v55 = vpop.f32.mrf.mxu0  ;;  %v1194_v10 = vmul.f32 %v1191_v3, %v1762_v54 }
 0x53e   : > { %v1186_v56 = vadd.f32 %v1184_v53, %v1176_v52  ;;  %v1177_v57 = vmul.f32 %v1174_v51, %v1124_v55 }
 0x53f   : > { %v1126_v58 = vpop.f32.mrf.mxu0 }
 0x540   : > { %v1189_v8 = vmax.f32 %v1186_v56, 0.0  ;;  %v1187_v2 = vadd.f32 %v1184_v53, %v1177_v57 }
 0x541   : > { %v1127_v59 = vpop.f32.mrf.mxu0 }
 0x542   : > { %v1190_v1 = vmax.f32 %v1187_v2, 0.0  ;;  %v1192_v4 = vmul.f32 %v1189_v8, %v1757_v44 }
 0x544   : > { %1198 = vrot.lane.b32.xlu1 %v1192_v4, %s1593_s28  ;;  %v1193_v6 = vmul.f32 %v1190_v1, %v1759_v49 }
 0x546   : > { %1200 = vrot.lane.b32.xlu0 %v1193_v6, %s1593_s28 }
 0x548   : > { %1202 = vrot.lane.b32.xlu1 %v1194_v10, %s1593_s28 }
 0x5b6   : > { %v1199_v62 = vpop.permute.xlu1 %1198 }
 0x5b7   : > { %1209 = vst.msk [vmem:[%s1649_s10] sm:$0xf] %vm581_vm14, %v1199_v62 }
 0x5b8   : > { %v1201_v12 = vpop.permute.xlu0 %1200 }
 0x5b9   : > { %v1204_v14 = vsel %vm575_vm15, %v1199_v62, %v1201_v12 }
 0x5ba   : > { %1210 = vst [vmem:[%s1649_s10 + $0x8] sm:$0xf] %v1204_v14  ;;  %v1203_v16 = vpop.permute.xlu1 %1202 }
 0x5bb   : > { %v1205_v44 = vsel %vm575_vm15, %v1201_v12, %v1203_v16 }
 0x5bc   : > { %1211 = vst.msk [vmem:[%s1649_s10 + $0x10] sm:$0xf] %vm584_vm0, %v1205_v44 }
 0x5bd PF: > { %s17_s24 = sadd.s32 1, %s1580_s24  }
 0x5be   : > { %p14_p4 = scmp.ge.s32.totalorder %s17_s24, 4  }
 0x5c0   :  { %16 = sbr.rel (!%p14_p4) target bundleno = 1 (0x1), region = 82 }

</bundles_post_ra>
